<compile_context>
chip_gen: v5e
topology: v5e:2x2
jax: 0.10.0
libtpu: 0.0.40
codegen_flags: <defaults>
</compile_context>

<pallas_src>
import functools

import jax
import jax.numpy as jnp
from jax import lax
from jax.experimental import pallas as pl
from jax.experimental.pallas import tpu as pltpu


def _round_up(x: int, m: int) -> int:
    return ((x + m - 1) // m) * m


def _neg_pearson_kernel(x_ref, y_ref, out_ref,
                        sx_ref, sy_ref, sxy_ref, sx2_ref, sy2_ref,
                        *, n_signal: float, num_chunks: int):
    t = pl.program_id(1)

    @pl.when(t == 0)
    def _init():
        zeros = jnp.zeros_like(sx_ref)
        sx_ref[...] = zeros
        sy_ref[...] = zeros
        sxy_ref[...] = zeros
        sx2_ref[...] = zeros
        sy2_ref[...] = zeros

    x = x_ref[...]          # (TB, TILE_T) float32
    y = y_ref[...]

    sx = sx_ref[...]
    sy = sy_ref[...]
    sxy = sxy_ref[...]
    sx2 = sx2_ref[...]
    sy2 = sy2_ref[...]
    # Pure-VPU, lane-width accumulation: no cross-lane (XLU) work per tile.
    for c in range(num_chunks):
        xc = x[:, c * 128:(c + 1) * 128]
        yc = y[:, c * 128:(c + 1) * 128]
        sx = sx + xc
        sy = sy + yc
        sxy = sxy + xc * yc
        sx2 = sx2 + xc * xc
        sy2 = sy2 + yc * yc
    sx_ref[...] = sx
    sy_ref[...] = sy
    sxy_ref[...] = sxy
    sx2_ref[...] = sx2
    sy2_ref[...] = sy2

    @pl.when(t == pl.num_programs(1) - 1)
    def _finalize():
        n = jnp.float32(n_signal)
        # Single XLU lane-reduce per statistic, once per batch block.
        sum_x = jnp.sum(sx_ref[...], axis=1, keepdims=True)    # (TB, 1)
        sum_y = jnp.sum(sy_ref[...], axis=1, keepdims=True)
        sum_xy = jnp.sum(sxy_ref[...], axis=1, keepdims=True)
        sum_x2 = jnp.sum(sx2_ref[...], axis=1, keepdims=True)
        sum_y2 = jnp.sum(sy2_ref[...], axis=1, keepdims=True)
        num = n * sum_xy - sum_x * sum_y
        var = (n * sum_x2 - sum_x * sum_x) * (n * sum_y2 - sum_y * sum_y)
        # TODO(synk): same NaN-on-constant-row / f32 one-pass-formula behaviour
        # as the PyTorch reference (no eps guard), kept deliberately.
        pearson = num * lax.rsqrt(var)
        out_ref[...] = jnp.broadcast_to(1.0 - pearson, out_ref.shape)


def _choose_tile_t(T: int) -> tuple[int, int]:
    """Pick a lane-aligned T tile (<=2048) keeping zero-padding overhead small."""
    t128 = _round_up(T, 128)
    for cand in (2048, 1024, 512, 256, 128):
        t_pad = _round_up(t128, cand)
        if t_pad - T <= max(T // 8, 127) or cand == 128:
            return cand, t_pad
    return 128, t128  # unreachable


def neg_pearson(preds: jax.Array, labels: jax.Array) -> jax.Array:
    assert preds.shape == labels.shape and preds.ndim == 2
    B, T = preds.shape

    # --- tiling / padding choices -----------------------------------------
    TILE_T, T_pad = _choose_tile_t(T)
    if B <= 64:
        TB = _round_up(B, 8)       # single sublane-aligned batch block
    else:
        TB = 64                    # ~1 MiB of input payload per grid step
    B_pad = _round_up(B, TB)

    x = preds.astype(jnp.float32)  # upcast once; all in-kernel math is f32
    y = labels.astype(jnp.float32)
    if (B_pad, T_pad) != (B, T):
        # Zero padding leaves all five per-row sums unchanged; padded rows are
        # dropped before the batch mean.
        x = jnp.pad(x, ((0, B_pad - B), (0, T_pad - T)))
        y = jnp.pad(y, ((0, B_pad - B), (0, T_pad - T)))

    grid = (B_pad // TB, T_pad // TILE_T)
    kernel = functools.partial(
        _neg_pearson_kernel, n_signal=float(T), num_chunks=TILE_T // 128)

    out = pl.pallas_call(
        kernel,
        out_shape=jax.ShapeDtypeStruct((B_pad, 128), jnp.float32),
        grid_spec=pltpu.PrefetchScalarGridSpec(
            num_scalar_prefetch=0,
            grid=grid,
            in_specs=[
                pl.BlockSpec((TB, TILE_T), lambda b, t: (b, t)),
                pl.BlockSpec((TB, TILE_T), lambda b, t: (b, t)),
            ],
            out_specs=pl.BlockSpec((TB, 128), lambda b, t: (b, 0)),
            scratch_shapes=[pltpu.VMEM((TB, 128), jnp.float32)
                            for _ in range(5)],
        ),
        compiler_params=pltpu.CompilerParams(
            dimension_semantics=("parallel", "arbitrary"),
            vmem_limit_bytes=32 * 1024 * 1024,
        ),
    )(x, y)

    # out[i, :] == (1 - pearson_i) broadcast across lanes (lane-dense store);
    # finish the tiny batch mean in JAX over the valid rows only.
    return jnp.mean(out[:B, 0])


def _neg_pearson_ref(preds, labels):
    # Pure-JAX reference mirroring the PyTorch loop.
    n = preds.shape[1]
    sum_x = jnp.sum(preds, axis=1)
    sum_y = jnp.sum(labels, axis=1)
    sum_xy = jnp.sum(preds * labels, axis=1)
    sum_x2 = jnp.sum(preds ** 2, axis=1)
    sum_y2 = jnp.sum(labels ** 2, axis=1)
    pearson = (n * sum_xy - sum_x * sum_y) / jnp.sqrt(
        (n * sum_x2 - sum_x ** 2) * (n * sum_y2 - sum_y ** 2))
    return jnp.mean(1.0 - pearson)


if __name__ == "__main__":
    key = jax.random.PRNGKey(0)
    # Small shapes: exercise B/T padding and a multi-tile T grid.
    for (B, T) in [(4, 300), (10, 256)]:
        key, k1, k2 = jax.random.split(key, 3)
        preds = jax.random.normal(k1, (B, T), dtype=jnp.float32) + 0.5
        labels = 0.7 * preds + 0.3 * jax.random.normal(k2, (B, T),
                                                       dtype=jnp.float32)
        loss = jax.block_until_ready(neg_pearson(preds, labels))
        ref = jax.block_until_ready(_neg_pearson_ref(preds, labels))
        assert jnp.allclose(loss, ref, rtol=2e-4, atol=2e-5), (B, T, loss, ref)
    print("KERNEL_OK")
</pallas_src>

<mosaic_0001>
module attributes {stable_mosaic.version = 11 : i64} {
  func.func @_neg_pearson_kernel(%arg0: i32, %arg1: i32, %arg2: memref<8x128xf32, #tpu.memory_space<vmem>>, %arg3: memref<8x128xf32, #tpu.memory_space<vmem>>, %arg4: memref<8x128xf32, #tpu.memory_space<vmem>>, %arg5: memref<8x128xf32, #tpu.memory_space<vmem>>, %arg6: memref<8x128xf32, #tpu.memory_space<vmem>>, %arg7: memref<8x128xf32, #tpu.memory_space<vmem>>, %arg8: memref<8x128xf32, #tpu.memory_space<vmem>>, %arg9: memref<8x128xf32, #tpu.memory_space<vmem>>) attributes {dimension_semantics = [#tpu.dimension_semantics<parallel>, #tpu.dimension_semantics<arbitrary>], iteration_bounds = array<i64: 1, 3>, scalar_prefetch = 0 : i64, scratch_operands = 5 : i64, tpu.core_type = #tpu.core_type<tc>, window_params = [{transform_indices = @transform_0, window_bounds = array<i64: 8, 128>}, {transform_indices = @transform_1, window_bounds = array<i64: 8, 128>}, {transform_indices = @transform_2, window_bounds = array<i64: 8, 128>}]} {
    %c0_i32 = arith.constant 0 : i32
    %0 = arith.cmpi eq, %arg1, %c0_i32 : i32
    %1 = arith.extui %0 : i1 to i32
    %c0_i32_0 = arith.constant 0 : i32
    %2 = arith.cmpi ne, %1, %c0_i32_0 : i32
    scf.if %2 {
      %cst = arith.constant 0.000000e+00 : f32
      %26 = vector.broadcast %cst : f32 to vector<8x128xf32>
      %c0_25 = arith.constant 0 : index
      %c0_26 = arith.constant 0 : index
      %27 = vector.load %arg5[%c0_25, %c0_26] : memref<8x128xf32, #tpu.memory_space<vmem>>, vector<8x128xf32>
      tpu.vector_store %arg5[%c0_25, %c0_26], %26 {strides = array<i32>} : memref<8x128xf32, #tpu.memory_space<vmem>>, vector<8x128xf32>,
      %c0_27 = arith.constant 0 : index
      %c0_28 = arith.constant 0 : index
      %28 = vector.load %arg6[%c0_27, %c0_28] : memref<8x128xf32, #tpu.memory_space<vmem>>, vector<8x128xf32>
      tpu.vector_store %arg6[%c0_27, %c0_28], %26 {strides = array<i32>} : memref<8x128xf32, #tpu.memory_space<vmem>>, vector<8x128xf32>,
      %c0_29 = arith.constant 0 : index
      %c0_30 = arith.constant 0 : index
      %29 = vector.load %arg7[%c0_29, %c0_30] : memref<8x128xf32, #tpu.memory_space<vmem>>, vector<8x128xf32>
      tpu.vector_store %arg7[%c0_29, %c0_30], %26 {strides = array<i32>} : memref<8x128xf32, #tpu.memory_space<vmem>>, vector<8x128xf32>,
      %c0_31 = arith.constant 0 : index
      %c0_32 = arith.constant 0 : index
      %30 = vector.load %arg8[%c0_31, %c0_32] : memref<8x128xf32, #tpu.memory_space<vmem>>, vector<8x128xf32>
      tpu.vector_store %arg8[%c0_31, %c0_32], %26 {strides = array<i32>} : memref<8x128xf32, #tpu.memory_space<vmem>>, vector<8x128xf32>,
      %c0_33 = arith.constant 0 : index
      %c0_34 = arith.constant 0 : index
      %31 = vector.load %arg9[%c0_33, %c0_34] : memref<8x128xf32, #tpu.memory_space<vmem>>, vector<8x128xf32>
      tpu.vector_store %arg9[%c0_33, %c0_34], %26 {strides = array<i32>} : memref<8x128xf32, #tpu.memory_space<vmem>>, vector<8x128xf32>,
    } else {
    }
    %c0 = arith.constant 0 : index
    %c0_1 = arith.constant 0 : index
    %3 = vector.load %arg2[%c0, %c0_1] : memref<8x128xf32, #tpu.memory_space<vmem>>, vector<8x128xf32>
    %c0_2 = arith.constant 0 : index
    %c0_3 = arith.constant 0 : index
    %4 = vector.load %arg3[%c0_2, %c0_3] : memref<8x128xf32, #tpu.memory_space<vmem>>, vector<8x128xf32>
    %c0_4 = arith.constant 0 : index
    %c0_5 = arith.constant 0 : index
    %5 = vector.load %arg5[%c0_4, %c0_5] : memref<8x128xf32, #tpu.memory_space<vmem>>, vector<8x128xf32>
    %c0_6 = arith.constant 0 : index
    %c0_7 = arith.constant 0 : index
    %6 = vector.load %arg6[%c0_6, %c0_7] : memref<8x128xf32, #tpu.memory_space<vmem>>, vector<8x128xf32>
    %c0_8 = arith.constant 0 : index
    %c0_9 = arith.constant 0 : index
    %7 = vector.load %arg7[%c0_8, %c0_9] : memref<8x128xf32, #tpu.memory_space<vmem>>, vector<8x128xf32>
    %c0_10 = arith.constant 0 : index
    %c0_11 = arith.constant 0 : index
    %8 = vector.load %arg8[%c0_10, %c0_11] : memref<8x128xf32, #tpu.memory_space<vmem>>, vector<8x128xf32>
    %c0_12 = arith.constant 0 : index
    %c0_13 = arith.constant 0 : index
    %9 = vector.load %arg9[%c0_12, %c0_13] : memref<8x128xf32, #tpu.memory_space<vmem>>, vector<8x128xf32>
    %10 = arith.addf %5, %3 : vector<8x128xf32>
    %11 = arith.addf %6, %4 : vector<8x128xf32>
    %12 = arith.mulf %3, %4 : vector<8x128xf32>
    %13 = arith.addf %7, %12 : vector<8x128xf32>
    %14 = arith.mulf %3, %3 : vector<8x128xf32>
    %15 = arith.addf %8, %14 : vector<8x128xf32>
    %16 = arith.mulf %4, %4 : vector<8x128xf32>
    %17 = arith.addf %9, %16 : vector<8x128xf32>
    %c0_14 = arith.constant 0 : index
    %c0_15 = arith.constant 0 : index
    %18 = vector.load %arg5[%c0_14, %c0_15] : memref<8x128xf32, #tpu.memory_space<vmem>>, vector<8x128xf32>
    tpu.vector_store %arg5[%c0_14, %c0_15], %10 {strides = array<i32>} : memref<8x128xf32, #tpu.memory_space<vmem>>, vector<8x128xf32>,
    %c0_16 = arith.constant 0 : index
    %c0_17 = arith.constant 0 : index
    %19 = vector.load %arg6[%c0_16, %c0_17] : memref<8x128xf32, #tpu.memory_space<vmem>>, vector<8x128xf32>
    tpu.vector_store %arg6[%c0_16, %c0_17], %11 {strides = array<i32>} : memref<8x128xf32, #tpu.memory_space<vmem>>, vector<8x128xf32>,
    %c0_18 = arith.constant 0 : index
    %c0_19 = arith.constant 0 : index
    %20 = vector.load %arg7[%c0_18, %c0_19] : memref<8x128xf32, #tpu.memory_space<vmem>>, vector<8x128xf32>
    tpu.vector_store %arg7[%c0_18, %c0_19], %13 {strides = array<i32>} : memref<8x128xf32, #tpu.memory_space<vmem>>, vector<8x128xf32>,
    %c0_20 = arith.constant 0 : index
    %c0_21 = arith.constant 0 : index
    %21 = vector.load %arg8[%c0_20, %c0_21] : memref<8x128xf32, #tpu.memory_space<vmem>>, vector<8x128xf32>
    tpu.vector_store %arg8[%c0_20, %c0_21], %15 {strides = array<i32>} : memref<8x128xf32, #tpu.memory_space<vmem>>, vector<8x128xf32>,
    %c0_22 = arith.constant 0 : index
    %c0_23 = arith.constant 0 : index
    %22 = vector.load %arg9[%c0_22, %c0_23] : memref<8x128xf32, #tpu.memory_space<vmem>>, vector<8x128xf32>
    tpu.vector_store %arg9[%c0_22, %c0_23], %17 {strides = array<i32>} : memref<8x128xf32, #tpu.memory_space<vmem>>, vector<8x128xf32>,
    %c2_i32 = arith.constant 2 : i32
    %23 = arith.cmpi eq, %arg1, %c2_i32 : i32
    %24 = arith.extui %23 : i1 to i32
    %c0_i32_24 = arith.constant 0 : i32
    %25 = arith.cmpi ne, %24, %c0_i32_24 : i32
    scf.if %25 {
      %c0_25 = arith.constant 0 : index
      %c0_26 = arith.constant 0 : index
      %26 = vector.load %arg5[%c0_25, %c0_26] : memref<8x128xf32, #tpu.memory_space<vmem>>, vector<8x128xf32>
      %cst = arith.constant dense<0.000000e+00> : vector<8xf32>
      %27 = vector.multi_reduction <add>, %26, %cst [1] : vector<8x128xf32> to vector<8xf32>
      %28 = vector.shape_cast %27 : vector<8xf32> to vector<8x1xf32>
      %c0_27 = arith.constant 0 : index
      %c0_28 = arith.constant 0 : index
      %29 = vector.load %arg6[%c0_27, %c0_28] : memref<8x128xf32, #tpu.memory_space<vmem>>, vector<8x128xf32>
      %cst_29 = arith.constant dense<0.000000e+00> : vector<8xf32>
      %30 = vector.multi_reduction <add>, %29, %cst_29 [1] : vector<8x128xf32> to vector<8xf32>
      %31 = vector.shape_cast %30 : vector<8xf32> to vector<8x1xf32>
      %c0_30 = arith.constant 0 : index
      %c0_31 = arith.constant 0 : index
      %32 = vector.load %arg7[%c0_30, %c0_31] : memref<8x128xf32, #tpu.memory_space<vmem>>, vector<8x128xf32>
      %cst_32 = arith.constant dense<0.000000e+00> : vector<8xf32>
      %33 = vector.multi_reduction <add>, %32, %cst_32 [1] : vector<8x128xf32> to vector<8xf32>
      %34 = vector.shape_cast %33 : vector<8xf32> to vector<8x1xf32>
      %c0_33 = arith.constant 0 : index
      %c0_34 = arith.constant 0 : index
      %35 = vector.load %arg8[%c0_33, %c0_34] : memref<8x128xf32, #tpu.memory_space<vmem>>, vector<8x128xf32>
      %cst_35 = arith.constant dense<0.000000e+00> : vector<8xf32>
      %36 = vector.multi_reduction <add>, %35, %cst_35 [1] : vector<8x128xf32> to vector<8xf32>
      %37 = vector.shape_cast %36 : vector<8xf32> to vector<8x1xf32>
      %c0_36 = arith.constant 0 : index
      %c0_37 = arith.constant 0 : index
      %38 = vector.load %arg9[%c0_36, %c0_37] : memref<8x128xf32, #tpu.memory_space<vmem>>, vector<8x128xf32>
      %cst_38 = arith.constant dense<0.000000e+00> : vector<8xf32>
      %39 = vector.multi_reduction <add>, %38, %cst_38 [1] : vector<8x128xf32> to vector<8xf32>
      %40 = vector.shape_cast %39 : vector<8xf32> to vector<8x1xf32>
      %cst_39 = arith.constant 3.000000e+02 : f32
      %41 = vector.broadcast %cst_39 : f32 to vector<8x1xf32>
      %42 = arith.mulf %41, %34 : vector<8x1xf32>
      %43 = arith.mulf %28, %31 : vector<8x1xf32>
      %44 = arith.subf %42, %43 : vector<8x1xf32>
      %cst_40 = arith.constant 3.000000e+02 : f32
      %45 = vector.broadcast %cst_40 : f32 to vector<8x1xf32>
      %46 = arith.mulf %45, %37 : vector<8x1xf32>
      %47 = arith.mulf %28, %28 : vector<8x1xf32>
      %48 = arith.subf %46, %47 : vector<8x1xf32>
      %cst_41 = arith.constant 3.000000e+02 : f32
      %49 = vector.broadcast %cst_41 : f32 to vector<8x1xf32>
      %50 = arith.mulf %49, %40 : vector<8x1xf32>
      %51 = arith.mulf %31, %31 : vector<8x1xf32>
      %52 = arith.subf %50, %51 : vector<8x1xf32>
      %53 = arith.mulf %48, %52 : vector<8x1xf32>
      %54 = math.rsqrt %53 : vector<8x1xf32>
      %55 = arith.mulf %44, %54 : vector<8x1xf32>
      %cst_42 = arith.constant 1.000000e+00 : f32
      %56 = vector.broadcast %cst_42 : f32 to vector<8x1xf32>
      %57 = arith.subf %56, %55 : vector<8x1xf32>
      %58 = vector.shape_cast %57 : vector<8x1xf32> to vector<8x1xf32>
      %59 = vector.broadcast %58 : vector<8x1xf32> to vector<8x128xf32>
      %c0_43 = arith.constant 0 : index
      %c0_44 = arith.constant 0 : index
      %60 = vector.load %arg4[%c0_43, %c0_44] : memref<8x128xf32, #tpu.memory_space<vmem>>, vector<8x128xf32>
      tpu.vector_store %arg4[%c0_43, %c0_44], %59 {strides = array<i32>} : memref<8x128xf32, #tpu.memory_space<vmem>>, vector<8x128xf32>,
    } else {
    }
    return
  }
  func.func @transform_0(%arg0: i32, %arg1: i32) -> (i32, i32) {
    %c0_i32 = arith.constant 0 : i32
    return %arg0, %arg1 : i32, i32
  }
  func.func @transform_1(%arg0: i32, %arg1: i32) -> (i32, i32) {
    %c0_i32 = arith.constant 0 : i32
    return %arg0, %arg1 : i32, i32
  }
  func.func @transform_2(%arg0: i32, %arg1: i32) -> (i32, i32) {
    %c0_i32 = arith.constant 0 : i32
    %c0_i32_0 = arith.constant 0 : i32
    return %arg0, %c0_i32 : i32, i32
  }
}

</mosaic_0001>

<bundles_post_ra>
// kernel: tpu_custom_call.1
= control target key start
LH: loop header
LB: loop body
LE: loop exit
PB: predicated region body
PF: predicated region fallthrough
CT: control target
= control target key end

     0   :  { %7 = vsyncpa [#allocation8], 0  ;;  %s733_s0 = inlined_call_operand.hbm [shape: f32[8,384], index: 0, kind: input, shape index: {}]   ;;  %s734_s1 = inlined_call_operand.hbm [shape: f32[8,384], index: 1, kind: input, shape index: {}]   ;;  %s735_s2 = inlined_call_operand.hbm [shape: f32[8,128], index: 2, kind: output, shape index: {}]  }
   0x1   :  { %9 = vsyncpa [#allocation8 + $0x1], 0 }
   0x2   :  { %10 = vsyncpa [#allocation11], 0 }
   0x3   :  { %12 = vsyncpa [#allocation11 + $0x1], 0 }
   0x4   :  { %13 = vsyncpa [#allocation9], 0  ;;  %s634_s9 = smov 0   ;;  %s636_s10 = smov 0  }
   0x5   :  { %s638_s11 = smov 0   ;;  %s640_s12 = smov 0  }
   0x6   :  { %s642_s13 = smov 0   ;;  %s644_s14 = smov 0  }
   0x7 LB: > { %s383_s15 = sadd.s32 4294967295, %s615_s14   ;;  %s28_s16 = sadd.s32 1, %s611_s13  ;;  %s615_s14 = sphi %s644_s14, %s19_s14   ;;  %s611_s13 = sphi %s642_s13, %s742_s13   ;;  %s607_s12 = sphi %s640_s12, %s741_s12   ;;  %s603_s11 = sphi %s638_s11, %s740_s11   ;;  %s599_s10 = sphi %s636_s10, %s739_s10   ;;  %s595_s9 = sphi %s634_s9, %s738_s9  }
   0x8   : > { %p29_p0 = scmp.ge.s32.totalorder %s28_s16, 3  ;;  %s40_s17 = sadd.s32 1, %s603_s11 }
   0x9   : > { %p47_p1 = scmp.ne.s32.totalorder %s603_s11, %s599_s10  ;;  %p48_p2 = scmp.eq.s32.totalorder %s615_s14, 0 }
   0xa   : > { %s744_s16 = smov (%p29_p0, %s28_s16), 0  ;;  %p53_p4 = scmp.ne.s32.totalorder %s599_s10, %s595_s9 }
   0xb   : > { %p670_p3 = por %p48_p2, %p47_p1  ;;  %s36_s19 = ssub.s32 %s611_s13, %s744_s16 }
   0xc   : > { %p54_p5 = scmp.eq.s32.totalorder %s383_s15, 0  ;;  %p38_p6 = scmp.eq.s32.totalorder %s36_s19, 0 }
   0xd   : > { %p414_p8 = scmp.lt.s32.totalorder %s615_s14, 3  ;;  %s131_s22 = sand.u32 1, %s603_s11  }
   0xe   : > { %p679_p7 = por %p54_p5, %p53_p4  ;;  %s387_s23 = sshll.u32 %s611_s13, 3 }
   0xf   : > { %s685_s21 = scalar_select %p38_p6, %s603_s11, %s40_s17  }
  0x10   : > { %s386_s24 = sshll.u32 %s131_s22, 3  ;;  %s141_s27 = scalar_lea.hbm %s733_s0, %s387_s23 }
  0x11   : > { %s143_s28 = sshll.u32 %s141_s27, 4  ;;  %s135_s29 = scalar_lea.vmem [#allocation7], %s386_s24  ;;  %s144_s28 = int_to_ptr.hbm [resolvable:$true] %s143_s28 }
  0x12   : > { %s145_s30 = sshll.u32 %s135_s29, 4  ;;  %p408_p9 = pnand %p414_p8, %p670_p3  ;;  %s146_s30 = int_to_ptr.vmem [resolvable:$true] %s145_s30 }
  0x13   : > { %p390_p10 = scmp.ge.s32.totalorder %s615_s14, 1  ;;  %p171_p11 = scmp.lt.s32.totalorder %s615_s14, 4 }
  0x14   : > { %s132_s3 = scalar_lea.sflag [#allocation8], %s131_s22  ;;  %s162_s6 = scalar_lea.hbm %s734_s1, %s387_s23 }
  0x15   : > { %410 = dma.hbm_to_vmem [thread:$0]  (!%p408_p9), %s144_s28, 128, %s146_s30, %s132_s3  }
  0x16   : > { %p172_p12 = pnand %p390_p10, %p171_p11  ;;  %s164_s7 = sshll.u32 %s162_s6, 4  ;;  %s165_s7 = int_to_ptr.hbm [resolvable:$true] %s164_s7 }
  0x17   : > { %s156_s8 = scalar_lea.vmem [#allocation10], %s386_s24  ;;  %s153_s17 = scalar_lea.sflag [#allocation11], %s131_s22 }
  0x18   : > { %s166_s9 = sshll.u32 %s156_s8, 4  ;;  %175 = sbr.rel (%p172_p12) target bundleno = 220 (0xdc), region = 28  ;;  %s167_s9 = int_to_ptr.vmem [resolvable:$true] %s166_s9 }
  0x19   : > { %413 = dma.hbm_to_vmem [thread:$0]  (!%p408_p9), %s165_s7, 128, %s167_s9, %s153_s17  }
  0x1a   : > { %s177_s18 = sand.u32 (!%p172_p12), 1, %s599_s10  }
  0x1b   : > { %s391_s19 = sshll.u32 (!%p172_p12), %s177_s18, 3  ;;  %s178_s25 = scalar_lea.sflag (!%p172_p12), [#allocation8], %s177_s18 }
  0x1c   : > { %s181_s26 = scalar_lea.vmem (!%p172_p12), [#allocation7], %s391_s19 }
  0x1d   : > { %582 = dma.done.wait (%p679_p7), %s178_s25, 128  }
  0x1e   : > { %584 = vsyncadd (%p679_p7), %s178_s25, 4294967168  ;;  %s188_s23 = scalar_lea.sflag [#allocation11], %s177_s18  ;;  %s191_s24 = scalar_lea.vmem [#allocation10], %s391_s19 }
  0x1f   : > { %586 = dma.done.wait (%p679_p7), %s188_s23, 128  }
  0x20   : > { %588 = vsyncadd (%p679_p7), %s188_s23, 4294967168  ;;  %p393_p13 = scmp.ne.s32.totalorder %s607_s12, 0 }
  0x22   : > { %216 = sbr.rel (%p393_p13) target bundleno = 45 (0x2d), region = 40 }
  0x27   : > { %v617_v0 = vmov 0.0  }
  0x28   : > { %217 = vst [vmem:[#allocation2] sm:$0xff] %v617_v0 }
  0x29   : > { %218 = vst [vmem:[#allocation3] sm:$0xff] %v617_v0 }
  0x2a   : > { %219 = vst [vmem:[#allocation4] sm:$0xff] %v617_v0 }
  0x2b   : > { %220 = vst [vmem:[#allocation5] sm:$0xff] %v617_v0 }
  0x2c   : > { %221 = vst [vmem:[#allocation6] sm:$0xff] %v617_v0 }
  0x2d PF: > { %v222_v1 = vld [vmem:[%s181_s26] sm:$0xff]  ;;  %v223_v3 = vld [vmem:[%s191_s24] sm:$0xff]  ;;  %p394_p0 = scmp.ne.s32.totalorder %s607_s12, 2 }
  0x2e   : > { %v231_v7 = vmul.f32 %v223_v3, %v222_v1  ;;  %v233_v9 = vmul.f32 %v222_v1, %v222_v1  ;;  %v235_v10 = vmul.f32 %v223_v3, %v223_v3 }
  0x2f   : > { %v224_v2 = vld [vmem:[#allocation2] sm:$0xff] }
  0x30   : > { %v229_v4 = vadd.f32 %v224_v2, %v222_v1  ;;  %v225_v5 = vld [vmem:[#allocation3] sm:$0xff] }
  0x31   : > { %v226_v6 = vld [vmem:[#allocation4] sm:$0xff]  ;;  %v230_v11 = vadd.f32 %v225_v5, %v223_v3 }
  0x32   : > { %v227_v8 = vld [vmem:[#allocation5] sm:$0xff]  ;;  %237 = vst [vmem:[#allocation2] sm:$0xff] %v229_v4  ;;  %v232_v13 = vadd.f32 %v231_v7, %v226_v6  ;;  %245 = sbr.rel (%p394_p0) target bundleno = 214 (0xd6), region = 44 }
  0x33   : > { %v228_v12 = vld [vmem:[#allocation6] sm:$0xff]  ;;  %v234_v14 = vadd.f32 %v233_v9, %v227_v8  ;;  %238 = vst [vmem:[#allocation3] sm:$0xff] %v230_v11 }
  0x34   : > { %v236_v15 = vadd.f32 %v235_v10, %v228_v12  ;;  %239 = vst [vmem:[#allocation4] sm:$0xff] %v232_v13 }
  0x35   : > { %240 = vst [vmem:[#allocation5] sm:$0xff] %v234_v14 }
  0x36   : > { %241 = vst [vmem:[#allocation6] sm:$0xff] %v236_v15 }
  0x39   : > { %v246_v17 = vld [vmem:[#allocation2] sm:$0xff] }
  0x3a   : > { %247 = vadd.xlane.f32.xlu0 %v246_v17  ;;  %v249_v20 = vld [vmem:[#allocation3] sm:$0xff] }
  0x3b   : > { %v252_v18 = vld [vmem:[#allocation4] sm:$0xff] }
  0x3c   : > { %v255_v16 = vld [vmem:[#allocation5] sm:$0xff]  ;;  %253 = vadd.xlane.f32.xlu2 %v252_v18 }
  0x3d   : > { %256 = vadd.xlane.f32.xlu1 %v255_v16  ;;  %v258_v19 = vld [vmem:[#allocation6] sm:$0xff] }
  0x42   : > { %250 = vadd.xlane.f32.xlu0 %v249_v20 }
  0x45   : > { %259 = vadd.xlane.f32.xlu1 %v258_v19 }
  0xad   : > { %v248_v22 = vpop.xlane.xlu0 %247 }
  0xae   : > { %v265_v24 = vmul.f32 %v248_v22, %v248_v22 }
  0xaf   : > { %v254_v34 = vpop.xlane.xlu2 %253 }
  0xb0   : > { %v257_v21 = vpop.xlane.xlu1 %256  ;;  %v261_v37 = vmul.f32 300.0, %v254_v34 }
  0xb1   : > { %v264_v23 = vmul.f32 300.0, %v257_v21 }
  0xb3   : > { %v266_v29 = vsub.f32 %v264_v23, %v265_v24 }
  0xb5   : > { %v251_v26 = vpop.xlane.xlu0 %250 }
  0xb6   : > { %v268_v28 = vmul.f32 %v251_v26, %v251_v26  ;;  %v262_v38 = vmul.f32 %v251_v26, %v248_v22 }
  0xb8   : > { %v260_v25 = vpop.xlane.xlu1 %259  ;;  %v263_v41 = vsub.f32 %v261_v37, %v262_v38 }
  0xb9   : > { %v267_v27 = vmul.f32 300.0, %v260_v25 }
  0xbb   : > { %v269_v30 = vsub.f32 %v267_v27, %v268_v28 }
  0xbd   : > { %v270_v31 = vmul.f32 %v269_v30, %v266_v29 }
  0xbf   : > { %467 = vrsqrt.f32 %v270_v31  ;;  %vm277_vm1 = vweird.f32 %v270_v31 }
  0xc5   : > { %v468_v32 = vpop.eup %467 }
  0xc6   : > { %v272_v33 = vmul.f32 %v468_v32, %v270_v31  ;;  %vm278_vm0 = vweird.f32 %v468_v32 }
  0xc7   : > { %vm279_vm2 = vmor %vm277_vm1, %vm278_vm0 }
  0xc8   : > { %v273_v35 = vmul.f32 %v468_v32, %v272_v33 }
  0xca   : > { %v274_v36 = vmul.f32 0.5, %v273_v35 }
  0xcc   : > { %v275_v39 = vsub.f32 1.5, %v274_v36 }
  0xce   : > { %v276_v40 = vmul.f32 %v468_v32, %v275_v39 }
  0xd0   : > { %v280_v42 = vsel %vm279_vm2, %v468_v32, %v276_v40 }
  0xd1   : > { %v281_v43 = vmul.f32 %v280_v42, %v263_v41 }
  0xd3   : > { %v282_v44 = vsub.f32 1.0, %v281_v43 }
  0xd5   : > { %283 = vst [vmem:[#allocation12] sm:$0xff] %v282_v44 }
  0xd6 PF: > { %p415_p1 = scmp.eq.s32.totalorder %s383_s15, 2  ;;  %s294_s22 = sshll.u32 %s735_s2, 4  ;;  %s295_s22 = int_to_ptr.hbm [resolvable:$true] %s294_s22 }
  0xd7   : > { %s618_s27 = smov [#allocation12]  }
  0xd8   : > { %s292_s28 = sshll.u32 %s618_s27, 4  ;;  %s293_s28 = int_to_ptr.vmem [resolvable:$true] %s292_s28 }
  0xd9   : > { %404 = dma.vmem_to_hbm [thread:$0]  (%p415_p1), %s293_s28, 128, %s295_s22, [#allocation9]  }
  0xda   : > { %590 = dma.done.wait (%p415_p1), [#allocation9], 128  }
  0xdb   : > { %592 = vsyncadd (%p415_p1), [#allocation9], 4294967168 }
  0xdc PF: > { %s19_s14 = sadd.s32 1, %s615_s14   ;;  %s738_s9 = smov %s599_s10 }
  0xdd   : > { %p16_p2 = scmp.ge.s32.totalorder %s19_s14, 5   ;;  %s739_s10 = smov %s603_s11 }
  0xde   : > { %s740_s11 = smov %s685_s21  ;;  %s741_s12 = smov %s611_s13 }
  0xdf   : > { %s742_s13 = smov %s744_s16  ;;  %18 = sbr.rel (!%p16_p2) target bundleno = 7 (0x7), region = 87 }
  0xe4   :  { %308 = vsyncpa [#allocation8], 1 }
  0xe5   :  { %310 = vsyncpa [#allocation8 + $0x1], 1 }
  0xe6   :  { %311 = vsyncpa [#allocation11], 1 }
  0xe7   :  { %313 = vsyncpa [#allocation11 + $0x1], 1 }
  0xe8   :  { %314 = vsyncpa [#allocation9], 1 }
  0xe9   :  { %316 = vsyncpa [#allocation9 + $0x1], 1 }

</bundles_post_ra>
